<compile_context>
chip_gen: v5e
topology: v5e:2x2
jax: 0.10.0
libtpu: 0.0.40
codegen_flags: <defaults>
</compile_context>

<pallas_src>
import functools

import jax
import jax.numpy as jnp
from jax.experimental import pallas as pl
from jax.experimental.pallas import tpu as pltpu

EPS = 1e-5
MOMENTUM = 0.1
_LANE = 128


def _vmem_budget():
    """(scoped-VMEM limit, pipelined working-set budget) per TPU generation."""
    cap = 64 * 1024 * 1024  # conservative default == v7x per-TC VMEM
    try:
        cap = int(getattr(pltpu.get_tpu_info(), "vmem_capacity_bytes", cap))
    except Exception:
        pass
    # leave headroom for Mosaic-materialized temporaries / spills
    limit = min((cap * 3) // 4, 96 * 1024 * 1024)   # v7x ~48 MiB, v5e/v6e ~96 MiB
    budget = (limit * 2) // 3                        # target for pipelined tiles
    return limit, budget


# ---------------------------------------------------------------------------
# Fused single-pass path: whole batch column resident in VMEM per C tile.
# ---------------------------------------------------------------------------

def _bwn1d_fused_kernel(scal_ref, x_ref, w_ref, g_ref, b_ref, rm_ref, rv_ref,
                        out_ref, nrm_ref, nrv_ref):
    # scalars hoisted to the wrapper (SMEM): [0] = 1/wsum, [1] = wsum/(wsum-1)
    inv_wsum = scal_ref[0]
    run_scale = scal_ref[1]

    x = x_ref[...].astype(jnp.float32)                            # (N, TC)
    # hoist the (N,1)->(N,TC) lane broadcast of w once; reuse for both reductions
    wb = jnp.broadcast_to(w_ref[...].astype(jnp.float32), x.shape)

    mean = jnp.sum(wb * x, axis=0, keepdims=True) * inv_wsum      # (1, TC)
    diff = x - mean
    var_b = jnp.sum((wb * diff) * diff, axis=0, keepdims=True) * inv_wsum  # biased

    inv_std = jax.lax.rsqrt(var_b + EPS)                          # EUP rsqrt
    scale = g_ref[...].astype(jnp.float32) * inv_std              # (1, TC)
    out_ref[...] = (diff * scale
                    + b_ref[...].astype(jnp.float32)).astype(out_ref.dtype)

    rm = rm_ref[...].astype(jnp.float32)
    rv = rv_ref[...].astype(jnp.float32)
    nrm_ref[...] = ((1.0 - MOMENTUM) * rm + MOMENTUM * mean).astype(nrm_ref.dtype)
    nrv_ref[...] = ((1.0 - MOMENTUM) * rv
                    + MOMENTUM * (var_b * run_scale)).astype(nrv_ref.dtype)


def _pick_tile_c_fused(n, c, budget):
    if c <= _LANE:
        return c  # single lane tile == full (small) feature dim

    def working_set(tc):  # 2x double-buffered (x + out) tiles + ~3 f32 temps
        return 7 * n * tc * 4

    tile = _LANE
    for cand in (2048, 1024, 512, 256, 128):
        if working_set(cand) <= budget:
            tile = cand
            break
    # keep >=2 grid steps (>=4 when C allows) so the DMA pipeline has work to
    # overlap and v7x megacore can shard the "parallel" C axis over both TCs
    target = 4 if c >= 4 * _LANE else 2
    while tile > _LANE and pl.cdiv(c, tile) < target:
        tile //= 2
    return tile


def _bwn1d_fused(x, w2, g2, b2, rm2, rv2, scalars, vmem_limit, budget):
    n, c = x.shape
    tile_c = _pick_tile_c_fused(n, c, budget)
    grid = (pl.cdiv(c, tile_c),)

    row_spec = pl.BlockSpec((1, tile_c), lambda j: (0, j))
    cost = pl.CostEstimate(flops=10 * n * c, transcendentals=c,
                           bytes_accessed=(2 * n * c + 6 * c) * 4)

    # NOTE: pipeline depth sweep (pl.Buffered(3) on x/out) is a possible
    # low-single-digit win on v7x once the grid has many steps; default kept.
    out, nrm, nrv = pl.pallas_call(
        _bwn1d_fused_kernel,
        out_shape=(
            jax.ShapeDtypeStruct((n, c), x.dtype),
            jax.ShapeDtypeStruct((1, c), rm2.dtype),
            jax.ShapeDtypeStruct((1, c), rv2.dtype),
        ),
        grid=grid,
        in_specs=[
            pl.BlockSpec(memory_space=pltpu.MemorySpace.SMEM),   # hoisted scalars
            pl.BlockSpec((n, tile_c), lambda j: (0, j)),         # x tile
            # w's block index is constant -> VMEM-resident across all C tiles.
            # TODO(synk): pipeline_mode=pl.Buffered(1) would drop its second
            # buffer (a few KiB of VMEM); left at default for lowering safety.
            pl.BlockSpec((n, 1), lambda j: (0, 0)),
            row_spec,                                            # gamma
            row_spec,                                            # beta
            row_spec,                                            # running_mean
            row_spec,                                            # running_var
        ],
        out_specs=(
            pl.BlockSpec((n, tile_c), lambda j: (0, j)),
            row_spec,
            row_spec,
        ),
        compiler_params=pltpu.CompilerParams(
            dimension_semantics=("parallel",),
            vmem_limit_bytes=vmem_limit,
        ),
        cost_estimate=cost,
    )(scalars, x, w2, g2, b2, rm2, rv2)
    return out, nrm, nrv


# ---------------------------------------------------------------------------
# Large-N two-pass path: stats accumulation over N tiles, then apply.
# ---------------------------------------------------------------------------

def _stats_kernel(n_total, tile_n, ragged_n, x_ref, w_ref, swx_ref, swxx_ref):
    i = pl.program_id(1)

    @pl.when(i == 0)
    def _():
        swx_ref[...] = jnp.zeros_like(swx_ref)
        swxx_ref[...] = jnp.zeros_like(swxx_ref)

    x = x_ref[...].astype(jnp.float32)        # (TN, TC)
    w = w_ref[...].astype(jnp.float32)        # (TN, 1)
    if ragged_n:  # static: mask rows of the ragged final batch tile
        row = jax.lax.broadcasted_iota(jnp.int32, w.shape, 0) + i * tile_n
        valid = row < n_total
        w = jnp.where(valid, w, 0.0)
        x = jnp.where(jnp.broadcast_to(valid, x.shape), x, 0.0)

    wb = jnp.broadcast_to(w, x.shape)         # single lane-broadcast, reused
    wx = wb * x
    swx_ref[...] += jnp.sum(wx, axis=0, keepdims=True)
    swxx_ref[...] += jnp.sum(wx * x, axis=0, keepdims=True)


def _apply_kernel(x_ref, scale_ref, shift_ref, out_ref):
    x = x_ref[...].astype(jnp.float32)
    out_ref[...] = (x * scale_ref[...] + shift_ref[...]).astype(out_ref.dtype)


def _bwn1d_two_pass(x, w2, g2, b2, rm2, rv2, inv_wsum, run_scale,
                    vmem_limit, budget, max_tile_n):
    n, c = x.shape

    # lane tiling: never larger than the array's last dim (ragged tails are
    # only ever the last block of a multi-block grid)
    if c <= _LANE:
        tile_c = c
    elif c < 2 * _LANE:
        tile_c = _LANE
    else:
        tile_c = 256 if c < 1024 else 512
    grid_c = pl.cdiv(c, tile_c)

    # batch tiling from the VMEM budget (multiple of 8, or the full dim)
    cap = budget // (6 * tile_c * 4)
    if max_tile_n is not None:
        cap = min(cap, max_tile_n)
    if cap >= n:
        tile_n = n
    else:
        tile_n = max(8, (cap // 8) * 8)
    grid_n = pl.cdiv(n, tile_n)
    ragged_n = (n % tile_n) != 0

    col_spec = pl.BlockSpec((1, tile_c), lambda j, i: (0, j))
    x_spec = pl.BlockSpec((tile_n, tile_c), lambda j, i: (i, j))

    # pass 1: weighted moment accumulation (N axis last, "arbitrary")
    swx, swxx = pl.pallas_call(
        functools.partial(_stats_kernel, n, tile_n, ragged_n),
        out_shape=(jax.ShapeDtypeStruct((1, c), jnp.float32),
                   jax.ShapeDtypeStruct((1, c), jnp.float32)),
        grid=(grid_c, grid_n),
        in_specs=[x_spec,
                  pl.BlockSpec((tile_n, 1), lambda j, i: (i, 0))],
        out_specs=(col_spec, col_spec),
        compiler_params=pltpu.CompilerParams(
            dimension_semantics=("parallel", "arbitrary"),
            vmem_limit_bytes=vmem_limit,
        ),
        cost_estimate=pl.CostEstimate(flops=5 * n * c, transcendentals=0,
                                      bytes_accessed=(n * c + 2 * c) * 4),
    )(x, w2)

    # tiny per-feature finalize in plain XLA (C-sized, negligible HBM traffic).
    # var_b = E_w[x^2] - mean^2 is mathematically identical to the centered
    # form; clamp at 0 to guard fp cancellation in this fallback path.
    mean = swx * inv_wsum
    var_b = jnp.maximum(swxx * inv_wsum - mean * mean, 0.0)
    inv_std = jax.lax.rsqrt(var_b + EPS)
    scale = g2.astype(jnp.float32) * inv_std
    shift = b2.astype(jnp.float32) - mean * scale
    nrm = ((1.0 - MOMENTUM) * rm2.astype(jnp.float32)
           + MOMENTUM * mean).astype(rm2.dtype)
    nrv = ((1.0 - MOMENTUM) * rv2.astype(jnp.float32)
           + MOMENTUM * (var_b * run_scale)).astype(rv2.dtype)

    # pass 2: per-element scale/shift (both grid axes parallel -> megacore)
    out = pl.pallas_call(
        _apply_kernel,
        out_shape=jax.ShapeDtypeStruct((n, c), x.dtype),
        grid=(grid_c, grid_n),
        in_specs=[x_spec, col_spec, col_spec],
        out_specs=x_spec,
        compiler_params=pltpu.CompilerParams(
            dimension_semantics=("parallel", "parallel"),
            vmem_limit_bytes=vmem_limit,
        ),
        cost_estimate=pl.CostEstimate(flops=2 * n * c, transcendentals=0,
                                      bytes_accessed=(2 * n * c + 4 * c) * 4),
    )(x, scale, shift)
    return out, nrm, nrv


# ---------------------------------------------------------------------------
# Public wrapper
# ---------------------------------------------------------------------------

@functools.partial(jax.jit, static_argnames=("force_two_pass", "max_tile_n"))
def batch_weight_norm1d(x, w, gamma, beta, running_mean, running_var,
                        force_two_pass=False, max_tile_n=None):
    """Training-mode forward of _BatchWeightNorm1d.

    x: (N, C), w: (N,), gamma/beta/running_*: (C,).
    Returns (out (N, C), new_running_mean (C,), new_running_var (C,)).
    """
    n, c = x.shape
    vmem_limit, budget = _vmem_budget()

    # hoisted scalars (computed once): 1/wsum and wsum/(wsum - 1)
    wsum = jnp.sum(w.astype(jnp.float32))
    inv_wsum = 1.0 / wsum
    run_scale = wsum / (wsum - 1.0)  # NOTE: Inf/negative if wsum <= 1 (same as PyTorch)

    w2 = w.reshape(n, 1)
    g2 = gamma.reshape(1, c)
    b2 = beta.reshape(1, c)
    rm2 = running_mean.reshape(1, c)
    rv2 = running_var.reshape(1, c)

    # fused single-pass path fits iff one 128-lane column tile (double-buffered
    # x + out blocks plus f32 temps) fits the pipelined-VMEM budget
    fused_fits = 7 * n * min(c, _LANE) * 4 <= budget
    if fused_fits and not force_two_pass:
        scalars = jnp.stack([inv_wsum, run_scale]).astype(jnp.float32)
        out, nrm, nrv = _bwn1d_fused(x, w2, g2, b2, rm2, rv2, scalars,
                                     vmem_limit, budget)
    else:
        out, nrm, nrv = _bwn1d_two_pass(x, w2, g2, b2, rm2, rv2,
                                        inv_wsum, run_scale,
                                        vmem_limit, budget, max_tile_n)
    return out, nrm[0], nrv[0]


# ---------------------------------------------------------------------------
# Reference + self-test
# ---------------------------------------------------------------------------

def _reference(x, w, gamma, beta, running_mean, running_var):
    """Plain-JAX reference mirroring the PyTorch code literally."""
    n, c = x.shape
    w_exd = w[:, None]
    mean = (w_exd * x).mean(0) * n / w.sum()
    tmp = (x - mean[None, :]) ** 2
    tem_v = tmp * w_exd
    new_var = tem_v.mean(0) * n / w.sum()
    scale = n * w.sum() / n
    run_var = new_var * scale / (scale - 1)
    out = (gamma[None, :] * (x - mean[None, :])
           / jnp.sqrt(new_var[None, :] + EPS) + beta[None, :])
    nrm = running_mean * (1 - MOMENTUM) + mean * MOMENTUM
    nrv = running_var * (1 - MOMENTUM) + run_var * MOMENTUM
    return out, nrm, nrv


def _check_case(key, n, c, force_two_pass=False, max_tile_n=None):
    kx, kw, kg, kb, km, kv = jax.random.split(key, 6)
    x = jax.random.normal(kx, (n, c), dtype=jnp.float32)
    # strictly positive per-sample weights (wsum > 1 so the running-var scale is finite)
    w = jax.random.uniform(kw, (n,), dtype=jnp.float32, minval=0.5, maxval=1.5)
    gamma = 1.0 + 0.1 * jax.random.normal(kg, (c,), dtype=jnp.float32)
    beta = 0.1 * jax.random.normal(kb, (c,), dtype=jnp.float32)
    running_mean = 0.05 * jax.random.normal(km, (c,), dtype=jnp.float32)
    running_var = 1.0 + 0.1 * jax.random.uniform(kv, (c,), dtype=jnp.float32)

    out, nrm, nrv = batch_weight_norm1d(
        x, w, gamma, beta, running_mean, running_var,
        force_two_pass=force_two_pass, max_tile_n=max_tile_n)
    jax.block_until_ready((out, nrm, nrv))

    ref_out, ref_nrm, ref_nrv = _reference(x, w, gamma, beta,
                                           running_mean, running_var)
    assert out.shape == (n, c) and nrm.shape == (c,) and nrv.shape == (c,)
    assert jnp.allclose(out, ref_out, atol=1e-4, rtol=1e-4), f"output mismatch ({n},{c})"
    assert jnp.allclose(nrm, ref_nrm, atol=1e-5, rtol=1e-5), f"running_mean mismatch ({n},{c})"
    assert jnp.allclose(nrv, ref_nrv, atol=1e-4, rtol=1e-4), f"running_var mismatch ({n},{c})"


if __name__ == "__main__":
    key = jax.random.PRNGKey(0)
    k1, k2, k3 = jax.random.split(key, 3)

    # small (batch, num_features) input, as BatchNorm1d expects: fused path, C < 128
    _check_case(k1, n=8, c=32)
    # fused path with a ragged last lane tile (C % 128 != 0): no padding passes
    _check_case(k2, n=16, c=160)
    # large-N two-pass path (forced at small shapes): N-tiled accumulation + masking
    _check_case(k3, n=20, c=40, force_two_pass=True, max_tile_n=8)

    print("KERNEL_OK")
</pallas_src>

<mosaic_0001>
module attributes {stable_mosaic.version = 11 : i64} {
  func.func @_bwn1d_fused_kernel(%arg0: i32, %arg1: memref<2xf32, #tpu.memory_space<smem>>, %arg2: memref<8x32xf32, #tpu.memory_space<vmem>>, %arg3: memref<8x1xf32, #tpu.memory_space<vmem>>, %arg4: memref<1x32xf32, #tpu.memory_space<vmem>>, %arg5: memref<1x32xf32, #tpu.memory_space<vmem>>, %arg6: memref<1x32xf32, #tpu.memory_space<vmem>>, %arg7: memref<1x32xf32, #tpu.memory_space<vmem>>, %arg8: memref<8x32xf32, #tpu.memory_space<vmem>>, %arg9: memref<1x32xf32, #tpu.memory_space<vmem>>, %arg10: memref<1x32xf32, #tpu.memory_space<vmem>>) attributes {dimension_semantics = [#tpu.dimension_semantics<parallel>], iteration_bounds = array<i64: 1>, scalar_prefetch = 0 : i64, scratch_operands = 0 : i64, tpu.core_type = #tpu.core_type<tc>, window_params = [{transform_indices = @transform_0, window_bounds = array<i64: 2>}, {transform_indices = @transform_1, window_bounds = array<i64: 8, 32>}, {pipeline_mode = #tpu.pipeline_mode<synchronous>, transform_indices = @transform_2, window_bounds = array<i64: 8, 1>}, {transform_indices = @transform_3, window_bounds = array<i64: 1, 32>}, {transform_indices = @transform_4, window_bounds = array<i64: 1, 32>}, {transform_indices = @transform_5, window_bounds = array<i64: 1, 32>}, {transform_indices = @transform_6, window_bounds = array<i64: 1, 32>}, {transform_indices = @transform_7, window_bounds = array<i64: 8, 32>}, {transform_indices = @transform_8, window_bounds = array<i64: 1, 32>}, {transform_indices = @transform_9, window_bounds = array<i64: 1, 32>}]} {
    %c0 = arith.constant 0 : index
    %0 = memref.load %arg1[%c0] : memref<2xf32, #tpu.memory_space<smem>>
    %c1 = arith.constant 1 : index
    %1 = memref.load %arg1[%c1] : memref<2xf32, #tpu.memory_space<smem>>
    %c0_0 = arith.constant 0 : index
    %c0_1 = arith.constant 0 : index
    %2 = vector.load %arg2[%c0_0, %c0_1] : memref<8x32xf32, #tpu.memory_space<vmem>>, vector<8x32xf32>
    %c0_2 = arith.constant 0 : index
    %c0_3 = arith.constant 0 : index
    %3 = vector.load %arg3[%c0_2, %c0_3] : memref<8x1xf32, #tpu.memory_space<vmem>>, vector<8x1xf32>
    %4 = vector.shape_cast %3 : vector<8x1xf32> to vector<8x1xf32>
    %5 = vector.broadcast %4 : vector<8x1xf32> to vector<8x32xf32>
    %6 = arith.mulf %5, %2 : vector<8x32xf32>
    %cst = arith.constant dense<0.000000e+00> : vector<32xf32>
    %7 = vector.multi_reduction <add>, %6, %cst [0] : vector<8x32xf32> to vector<32xf32>
    %8 = vector.shape_cast %7 : vector<32xf32> to vector<1x32xf32>
    %9 = vector.broadcast %0 : f32 to vector<1x32xf32>
    %10 = arith.mulf %8, %9 : vector<1x32xf32>
    %11 = vector.broadcast %10 : vector<1x32xf32> to vector<8x32xf32>
    %12 = arith.subf %2, %11 : vector<8x32xf32>
    %13 = arith.mulf %5, %12 : vector<8x32xf32>
    %14 = arith.mulf %13, %12 : vector<8x32xf32>
    %cst_4 = arith.constant dense<0.000000e+00> : vector<32xf32>
    %15 = vector.multi_reduction <add>, %14, %cst_4 [0] : vector<8x32xf32> to vector<32xf32>
    %16 = vector.shape_cast %15 : vector<32xf32> to vector<1x32xf32>
    %17 = vector.broadcast %0 : f32 to vector<1x32xf32>
    %18 = arith.mulf %16, %17 : vector<1x32xf32>
    %cst_5 = arith.constant 9.99999974E-6 : f32
    %19 = vector.broadcast %cst_5 : f32 to vector<1x32xf32>
    %20 = arith.addf %18, %19 : vector<1x32xf32>
    %21 = math.rsqrt %20 : vector<1x32xf32>
    %c0_6 = arith.constant 0 : index
    %c0_7 = arith.constant 0 : index
    %22 = vector.load %arg4[%c0_6, %c0_7] : memref<1x32xf32, #tpu.memory_space<vmem>>, vector<1x32xf32>
    %23 = arith.mulf %22, %21 : vector<1x32xf32>
    %24 = vector.broadcast %23 : vector<1x32xf32> to vector<8x32xf32>
    %25 = arith.mulf %12, %24 : vector<8x32xf32>
    %c0_8 = arith.constant 0 : index
    %c0_9 = arith.constant 0 : index
    %26 = vector.load %arg5[%c0_8, %c0_9] : memref<1x32xf32, #tpu.memory_space<vmem>>, vector<1x32xf32>
    %27 = vector.broadcast %26 : vector<1x32xf32> to vector<8x32xf32>
    %28 = arith.addf %25, %27 : vector<8x32xf32>
    %c0_10 = arith.constant 0 : index
    %c0_11 = arith.constant 0 : index
    %29 = vector.load %arg8[%c0_10, %c0_11] : memref<8x32xf32, #tpu.memory_space<vmem>>, vector<8x32xf32>
    tpu.vector_store %arg8[%c0_10, %c0_11], %28 {strides = array<i32>} : memref<8x32xf32, #tpu.memory_space<vmem>>, vector<8x32xf32>,
    %c0_12 = arith.constant 0 : index
    %c0_13 = arith.constant 0 : index
    %30 = vector.load %arg6[%c0_12, %c0_13] : memref<1x32xf32, #tpu.memory_space<vmem>>, vector<1x32xf32>
    %c0_14 = arith.constant 0 : index
    %c0_15 = arith.constant 0 : index
    %31 = vector.load %arg7[%c0_14, %c0_15] : memref<1x32xf32, #tpu.memory_space<vmem>>, vector<1x32xf32>
    %cst_16 = arith.constant 0.899999976 : f32
    %32 = vector.broadcast %cst_16 : f32 to vector<1x32xf32>
    %33 = arith.mulf %32, %30 : vector<1x32xf32>
    %cst_17 = arith.constant 1.000000e-01 : f32
    %34 = vector.broadcast %cst_17 : f32 to vector<1x32xf32>
    %35 = arith.mulf %34, %10 : vector<1x32xf32>
    %36 = arith.addf %33, %35 : vector<1x32xf32>
    %c0_18 = arith.constant 0 : index
    %c0_19 = arith.constant 0 : index
    %37 = vector.load %arg9[%c0_18, %c0_19] : memref<1x32xf32, #tpu.memory_space<vmem>>, vector<1x32xf32>
    tpu.vector_store %arg9[%c0_18, %c0_19], %36 {strides = array<i32>} : memref<1x32xf32, #tpu.memory_space<vmem>>, vector<1x32xf32>,
    %cst_20 = arith.constant 0.899999976 : f32
    %38 = vector.broadcast %cst_20 : f32 to vector<1x32xf32>
    %39 = arith.mulf %38, %31 : vector<1x32xf32>
    %40 = vector.broadcast %1 : f32 to vector<1x32xf32>
    %41 = arith.mulf %18, %40 : vector<1x32xf32>
    %cst_21 = arith.constant 1.000000e-01 : f32
    %42 = vector.broadcast %cst_21 : f32 to vector<1x32xf32>
    %43 = arith.mulf %42, %41 : vector<1x32xf32>
    %44 = arith.addf %39, %43 : vector<1x32xf32>
    %c0_22 = arith.constant 0 : index
    %c0_23 = arith.constant 0 : index
    %45 = vector.load %arg10[%c0_22, %c0_23] : memref<1x32xf32, #tpu.memory_space<vmem>>, vector<1x32xf32>
    tpu.vector_store %arg10[%c0_22, %c0_23], %44 {strides = array<i32>} : memref<1x32xf32, #tpu.memory_space<vmem>>, vector<1x32xf32>,
    return
  }
  func.func @transform_0(%arg0: i32) -> i32 {
    %c0_i32 = arith.constant 0 : i32
    %c0_i32_0 = arith.constant 0 : i32
    return %c0_i32 : i32
  }
  func.func @transform_1(%arg0: i32) -> (i32, i32) {
    %c0_i32 = arith.constant 0 : i32
    %c0_i32_0 = arith.constant 0 : i32
    return %c0_i32, %arg0 : i32, i32
  }
  func.func @transform_2(%arg0: i32) -> (i32, i32) {
    %c0_i32 = arith.constant 0 : i32
    %c0_i32_0 = arith.constant 0 : i32
    %c0_i32_1 = arith.constant 0 : i32
    return %c0_i32, %c0_i32_0 : i32, i32
  }
  func.func @transform_3(%arg0: i32) -> (i32, i32) {
    %c0_i32 = arith.constant 0 : i32
    %c0_i32_0 = arith.constant 0 : i32
    return %c0_i32, %arg0 : i32, i32
  }
  func.func @transform_4(%arg0: i32) -> (i32, i32) {
    %c0_i32 = arith.constant 0 : i32
    %c0_i32_0 = arith.constant 0 : i32
    return %c0_i32, %arg0 : i32, i32
  }
  func.func @transform_5(%arg0: i32) -> (i32, i32) {
    %c0_i32 = arith.constant 0 : i32
    %c0_i32_0 = arith.constant 0 : i32
    return %c0_i32, %arg0 : i32, i32
  }
  func.func @transform_6(%arg0: i32) -> (i32, i32) {
    %c0_i32 = arith.constant 0 : i32
    %c0_i32_0 = arith.constant 0 : i32
    return %c0_i32, %arg0 : i32, i32
  }
  func.func @transform_7(%arg0: i32) -> (i32, i32) {
    %c0_i32 = arith.constant 0 : i32
    %c0_i32_0 = arith.constant 0 : i32
    return %c0_i32, %arg0 : i32, i32
  }
  func.func @transform_8(%arg0: i32) -> (i32, i32) {
    %c0_i32 = arith.constant 0 : i32
    %c0_i32_0 = arith.constant 0 : i32
    return %c0_i32, %arg0 : i32, i32
  }
  func.func @transform_9(%arg0: i32) -> (i32, i32) {
    %c0_i32 = arith.constant 0 : i32
    %c0_i32_0 = arith.constant 0 : i32
    return %c0_i32, %arg0 : i32, i32
  }
}

</mosaic_0001>

<bundles_post_ra>
// kernel: batch_weight_norm1d.1
= control target key start
LH: loop header
LB: loop body
LE: loop exit
PB: predicated region body
PF: predicated region fallthrough
CT: control target
= control target key end

     0   :  { %15 = vsyncpa [#allocation4], 0  ;;  %s352_s0 = inlined_call_operand.vmem [shape: f32[2], index: 0, kind: input, shape index: {}]   ;;  %s353_s1 = inlined_call_operand.vmem [shape: f32[8,32], index: 1, kind: input, shape index: {}]   ;;  %s354_s2 = inlined_call_operand.vmem [shape: f32[8,1], index: 2, kind: input, shape index: {}]   ;;  %s355_s3 = inlined_call_operand.vmem [shape: f32[1,32], index: 3, kind: input, shape index: {}]   ;;  %s356_s4 = inlined_call_operand.vmem [shape: f32[1,32], index: 4, kind: input, shape index: {}]   ;;  %s357_s5 = inlined_call_operand.vmem [shape: f32[1,32], index: 5, kind: input, shape index: {}]   ;;  %s358_s6 = inlined_call_operand.vmem [shape: f32[1,32], index: 6, kind: input, shape index: {}]   ;;  %s359_s7 = inlined_call_operand.hbm [shape: f32[8,32], index: 7, kind: output, shape index: {0}]   ;;  %s360_s8 = inlined_call_operand.hbm [shape: f32[1,32], index: 8, kind: output, shape index: {1}]   ;;  %s361_s9 = inlined_call_operand.hbm [shape: f32[1,32], index: 9, kind: output, shape index: {2}]  }
   0x1   :  { %16 = vsyncpa [#allocation3], 0 }
   0x2   :  { %17 = vsyncpa [#allocation7], 0  ;;  %s23_s11 = sshll.u32 %s352_s0, 4  ;;  %s259_s12 = smov [#allocation2]   ;;  %s24_s11 = int_to_ptr.vmem [resolvable:$true] %s23_s11 }
   0x3   :  { %26 = dma.vmem_to_smem %s24_s11, 16, %s259_s12, [#allocation4]  }
   0x4   :  { %253 = dma.done.wait [#allocation4], 16  }
   0x5   :  { %254 = vsyncadd [#allocation4], 4294967280 }
   0x6   :  { %43 = sfence }
   0x7   :  { %v47_v0 = vld [vmem:[%s354_s2] sm:$0xff]  ;;  %v260_v1 = vmov 0   ;;  %vm54_vm0 = vcmask 261120   ;;  %s324_s0 = sld [smem:[#allocation2]]  ;;  %s129_s21 = sshll.u32 %s360_s8, 4  ;;  %vm103_vm1 = vcmask 253952   ;;  %s130_s21 = int_to_ptr.hbm [resolvable:$true] %s129_s21 }
   0x8   :  { %165 = vset.pattern.permute.xlu0 %v260_v1  ;;  %v46_v2 = vld [vmem:[%s353_s1] sm:$0xff]  ;;  %s261_s1 = smov [#allocation6]   ;;  %s262_s23 = smov [#allocation8]  }
   0x9   :  { %50 = vperm.xlu0 %165, %v47_v0   ;;  %v98_v12 = vld [vmem:[%s357_s5] sm:$0x1]  ;;  %s127_s18 = sshll.u32 %s261_s1, 4  ;;  %s159_s5 = sld [smem:[#allocation2 + $0x1]]  ;;  %s128_s18 = int_to_ptr.vmem [resolvable:$true] %s127_s18 }
   0xa   :  { %v100_v15 = vmul.f32 0.9, %v98_v12  ;;  %v99_v28 = vld [vmem:[%s358_s6] sm:$0x1]  ;;  %s138_s24 = sshll.u32 %s262_s23, 4  ;;  %s140_s27 = sshll.u32 %s361_s9, 4  ;;  %s139_s24 = int_to_ptr.vmem [resolvable:$true] %s138_s24  ;;  %s141_s27 = int_to_ptr.hbm [resolvable:$true] %s140_s27 }
   0xb   :  { %v105_v32 = vmul.f32 0.9, %v99_v28  ;;  %v86_v42 = vld [vmem:[%s355_s3] sm:$0x1]  ;;  %s263_s30 = smov [#allocation5]   ;;  %s118_s13 = sshll.u32 %s359_s7, 4  ;;  %s119_s13 = int_to_ptr.hbm [resolvable:$true] %s118_s13 }
   0xc   :  { %v166_v46 = vld [vmem:[%s356_s4] ss:$0 sm:$0xff]  ;;  %s116_s10 = sshll.u32 %s263_s30, 4  ;;  %s117_s10 = int_to_ptr.vmem [resolvable:$true] %s116_s10 }
   0xd   :  { %v62_v11 = vstv %s324_s0 }
   0xf   :  { %v106_v29 = vstv %s159_s5 }
  0x7b   :  { %v51_v3 = vpop.permute.xlu0 %50 }
  0x7c   :  { %v53_v4 = vmul.f32 %v51_v3, %v46_v2 }
  0x7e   :  { %v55_v5 = vsel %vm54_vm0, %v53_v4, 0.0 }
  0x7f   :  { %v56_v6 = vrot.slane %v55_v5, 4 }
  0x81   :  { %v57_v7 = vadd.f32 %v56_v6, %v55_v5 }
  0x83   :  { %v58_v8 = vrot.slane %v57_v7, 2 }
  0x85   :  { %v59_v9 = vadd.f32 %v58_v8, %v57_v7 }
  0x87   :  { %v60_v10 = vrot.slane %v59_v9, 1 }
  0x89   :  { %v61_v13 = vadd.f32 %v60_v10, %v59_v9 }
  0x8b   :  { %v63_v14 = vmul.f32 %v62_v11, %v61_v13 }
  0x8d   :  { %v64_v16 = vsub.f32 %v46_v2, %v63_v14  ;;  %v101_v17 = vmul.f32 0.1, %v63_v14 }
  0x8f   :  { %v65_v18 = vmul.f32 %v64_v16, %v51_v3  ;;  %v102_v19 = vadd.f32 %v101_v17, %v100_v15 }
  0x91   :  { %v66_v20 = vmul.f32 %v65_v18, %v64_v16  ;;  %104 = vst.msk [vmem:[#allocation6] sm:$0x1] %vm103_vm1, %v102_v19 }
  0x92   :  { %132 = dma.vmem_to_hbm [thread:$0]  %s128_s18, 16, %s130_s21, [#allocation7]  }
  0x93   :  { %v67_v21 = vsel %vm54_vm0, %v66_v20, 0.0 }
  0x94   :  { %v68_v22 = vrot.slane %v67_v21, 4 }
  0x96   :  { %v69_v23 = vadd.f32 %v68_v22, %v67_v21 }
  0x98   :  { %v70_v24 = vrot.slane %v69_v23, 2 }
  0x9a   :  { %v71_v25 = vadd.f32 %v70_v24, %v69_v23 }
  0x9c   :  { %v72_v26 = vrot.slane %v71_v25, 1 }
  0x9e   :  { %v73_v27 = vadd.f32 %v72_v26, %v71_v25 }
  0xa0   :  { %v74_v30 = vmul.f32 %v73_v27, %v62_v11 }
  0xa2   :  { %v75_v31 = vadd.f32 1e-05, %v74_v30  ;;  %v107_v33 = vmul.f32 %v106_v29, %v74_v30 }
  0xa4   :  { %167 = vrsqrt.f32 %v75_v31  ;;  %v108_v34 = vmul.f32 0.1, %v107_v33  ;;  %vm82_vm3 = vweird.f32 %v75_v31 }
  0xa6   :  { %v109_v35 = vadd.f32 %v108_v34, %v105_v32 }
  0xa8   :  { %110 = vst.msk [vmem:[#allocation8] sm:$0x1] %vm103_vm1, %v109_v35 }
  0xa9   :  { %143 = dma.vmem_to_hbm [thread:$0]  %s139_s24, 16, %s141_s27, [#allocation7]  }
  0xaa   :  { %v168_v36 = vpop.eup %167 }
  0xab   :  { %v77_v37 = vmul.f32 %v168_v36, %v75_v31  ;;  %vm83_vm2 = vweird.f32 %v168_v36 }
  0xac   :  { %vm84_vm4 = vmor %vm82_vm3, %vm83_vm2 }
  0xad   :  { %v78_v38 = vmul.f32 %v168_v36, %v77_v37 }
  0xaf   :  { %v79_v39 = vmul.f32 0.5, %v78_v38 }
  0xb1   :  { %v80_v40 = vsub.f32 1.5, %v79_v39 }
  0xb3   :  { %v81_v41 = vmul.f32 %v168_v36, %v80_v40 }
  0xb5   :  { %v85_v43 = vsel %vm84_vm4, %v168_v36, %v81_v41 }
  0xb6   :  { %v87_v44 = vmul.f32 %v86_v42, %v85_v43 }
  0xb8   :  { %v89_v45 = vperm.slane %v87_v44, 0 }
  0xba   :  { %v91_v47 = vmul.f32 %v89_v45, %v64_v16 }
  0xbc   :  { %v96_v48 = vadd.f32 %v166_v46, %v91_v47 }
  0xbe   :  { %97 = vst.msk [vmem:[#allocation5] sm:$0xff] %vm54_vm0, %v96_v48 }
  0xbf   :  { %121 = dma.vmem_to_hbm [thread:$0]  %s117_s10, 128, %s119_s13, [#allocation3]  }
  0xc0   :  { %255 = dma.done.wait [#allocation3], 128  }
  0xc1   :  { %256 = vsyncadd [#allocation3], 4294967168 }
  0xc2   :  { %257 = dma.done.wait [#allocation7], 32  }
  0xc3   :  { %258 = vsyncadd [#allocation7], 4294967264 }
  0xc4   :  { %156 = vsyncpa [#allocation3], 1 }
  0xc5   :  { %157 = vsyncpa [#allocation7], 1 }
  0xc6   :  { %158 = vsyncpa [#allocation4], 1 }

</bundles_post_ra>
